<compile_context>
chip_gen: v7x
topology: tpu7x:2x2x1
jax: 0.10.0
libtpu: 0.0.40
codegen_flags: <defaults>
</compile_context>

<pallas_src>
import functools

import jax
import jax.numpy as jnp
from jax.experimental import pallas as pl
from jax.experimental.pallas import tpu as pltpu


def _round_up(n: int, m: int) -> int:
    return pl.cdiv(n, m) * m


def _ffn_kernel(x_ref, w0_ref, b0_ref, w1_ref, b1_ref, w2_ref, b2_ref, o_ref, acc_ref):
    # x_ref:  (tm, Dp)  compute dtype (bf16)
    # w0/w1:  (Dp, tk)  compute dtype     b0/b1: (1, tk) f32
    # w2:     (tk, Dp)  compute dtype     b2:    (1, Dp) f32
    # o_ref:  (tm, Dp)  output dtype      acc_ref: (tm, Dp) f32 scratch
    k = pl.program_id(1)

    @pl.when(k == 0)
    def _init():
        # Hoist the output bias into the accumulator init (broadcast once per row tile).
        acc_ref[...] = jnp.broadcast_to(b2_ref[...], acc_ref.shape).astype(jnp.float32)

    x = x_ref[...]

    # Gate / up projections on the MXU (bf16 in, f32 accumulate).
    o0 = jnp.dot(x, w0_ref[...], preferred_element_type=jnp.float32) + b0_ref[...]
    o1 = jnp.dot(x, w1_ref[...], preferred_element_type=jnp.float32) + b1_ref[...]

    # SiLU gate in f32 (EUP sigmoid, VPU multiplies); cast down only for the MXU.
    og = o0 * (o1 * jax.nn.sigmoid(o1))

    # Partial down-projection for this H chunk, accumulated in f32.
    acc_ref[...] += jnp.dot(og.astype(w2_ref.dtype), w2_ref[...],
                            preferred_element_type=jnp.float32)

    @pl.when(k == pl.num_programs(1) - 1)
    def _finalize():
        o_ref[...] = acc_ref[...].astype(o_ref.dtype)


@functools.partial(jax.jit, static_argnames=("tm", "tk", "compute_dtype"))
def ffn_pallas(x, w0, b0, w1, b1, w2, b2, *, tm=256, tk=512,
               compute_dtype=jnp.bfloat16):
    """x: [B, S, D] -> [B, S, D].  Weights stored as [in_dim, out_dim]."""
    B, S, D = x.shape
    H = w0.shape[1]
    M = B * S
    out_dtype = x.dtype

    # Effective tile sizes, clamped so tiny test shapes don't blow up the padding.
    # (tm=128 is plenty on v5e's 128x128 MXU; 256 feeds v6e/v7x's 256x256 MXU.)
    tm_e = min(tm, _round_up(M, 8))
    tk_e = min(tk, _round_up(H, 128))

    M_pad = _round_up(M, tm_e)
    D_pad = _round_up(D, 128)   # lane-dense last dim for loads/stores and MXU
    H_pad = _round_up(H, tk_e)

    # Zero-pad (zeros in padded H/D regions contribute exactly 0 to the result).
    x2 = jnp.pad(x.reshape(M, D).astype(compute_dtype),
                 ((0, M_pad - M), (0, D_pad - D)))
    w0p = jnp.pad(w0.astype(compute_dtype), ((0, D_pad - D), (0, H_pad - H)))
    w1p = jnp.pad(w1.astype(compute_dtype), ((0, D_pad - D), (0, H_pad - H)))
    w2p = jnp.pad(w2.astype(compute_dtype), ((0, H_pad - H), (0, D_pad - D)))
    b0p = jnp.pad(b0.astype(jnp.float32), (0, H_pad - H)).reshape(1, H_pad)
    b1p = jnp.pad(b1.astype(jnp.float32), (0, H_pad - H)).reshape(1, H_pad)
    b2p = jnp.pad(b2.astype(jnp.float32), (0, D_pad - D)).reshape(1, D_pad)

    grid = (M_pad // tm_e, H_pad // tk_e)

    bytes_per = jnp.dtype(compute_dtype).itemsize
    cost = pl.CostEstimate(
        flops=6 * M * D * H,                 # 2 up-proj + 1 down-proj GEMMs
        transcendentals=M * H,               # sigmoid in the SiLU gate
        bytes_accessed=(M * D + 2 * D * H + H * D) * bytes_per
                       + M * D * jnp.dtype(out_dtype).itemsize
                       + (2 * H + D) * 4,
    )

    out2 = pl.pallas_call(
        _ffn_kernel,
        out_shape=jax.ShapeDtypeStruct((M_pad, D_pad), out_dtype),
        grid_spec=pltpu.PrefetchScalarGridSpec(
            num_scalar_prefetch=0,
            grid=grid,
            in_specs=[
                pl.BlockSpec((tm_e, D_pad), lambda i, k: (i, 0)),   # x tile
                pl.BlockSpec((D_pad, tk_e), lambda i, k: (0, k)),   # w0 H-chunk
                pl.BlockSpec((1, tk_e),     lambda i, k: (0, k)),   # b0 H-chunk
                pl.BlockSpec((D_pad, tk_e), lambda i, k: (0, k)),   # w1 H-chunk
                pl.BlockSpec((1, tk_e),     lambda i, k: (0, k)),   # b1 H-chunk
                pl.BlockSpec((tk_e, D_pad), lambda i, k: (k, 0)),   # w2 H-chunk
                pl.BlockSpec((1, D_pad),    lambda i, k: (0, 0)),   # b2
            ],
            out_specs=pl.BlockSpec((tm_e, D_pad), lambda i, k: (i, 0)),
            scratch_shapes=[pltpu.VMEM((tm_e, D_pad), jnp.float32)],
        ),
        compiler_params=pltpu.CompilerParams(
            dimension_semantics=("parallel", "arbitrary"),
            # Fits double-buffered bf16 weight/activation tiles at the default
            # (tm=256, tk=512) even for large D, while leaving headroom under
            # v7x's 64 MiB physical VMEM (v5e/v6e have 128 MiB).
            vmem_limit_bytes=48 * 1024 * 1024,
        ),
        cost_estimate=cost,
    )(x2, w0p, b0p, w1p, b1p, w2p, b2p)

    return out2[:M, :D].reshape(B, S, D)


def ffn_reference(x, w0, b0, w1, b1, w2, b2):
    o0 = x @ w0 + b0
    o1 = x @ w1 + b1
    g = o1 * jax.nn.sigmoid(o1)
    return (o0 * g) @ w2 + b2


if __name__ == "__main__":
    # Small shapes consistent with the module: batch=2, seq=8, input_dim=32, hide_dim=64.
    B, S, D, H = 2, 8, 32, 64
    key = jax.random.PRNGKey(0)
    kx, k0, kb0, k1, kb1, k2, kb2 = jax.random.split(key, 7)

    x = jax.random.normal(kx, (B, S, D), dtype=jnp.float32)
    # Deterministic synthetic parameters (weights stored as [in, out]).
    w0 = jax.random.normal(k0, (D, H), dtype=jnp.float32) * 0.05
    b0 = jax.random.normal(kb0, (H,), dtype=jnp.float32) * 0.01
    w1 = jax.random.normal(k1, (D, H), dtype=jnp.float32) * 0.05
    b1 = jax.random.normal(kb1, (H,), dtype=jnp.float32) * 0.01
    w2 = jax.random.normal(k2, (H, D), dtype=jnp.float32) * 0.05
    b2 = jax.random.normal(kb2, (D,), dtype=jnp.float32) * 0.01

    out = ffn_pallas(x, w0, b0, w1, b1, w2, b2)
    out = jax.block_until_ready(out)

    ref = ffn_reference(x, w0, b0, w1, b1, w2, b2)
    assert out.shape == (B, S, D)
    # bf16 MXU operands with f32 accumulation -> compare with a bf16-appropriate tolerance.
    assert jnp.allclose(out, ref, atol=1e-2, rtol=1e-2), "mismatch vs reference"

    print("KERNEL_OK")
</pallas_src>

<mosaic_0001>
module attributes {stable_mosaic.version = 11 : i64} {
  func.func @_ffn_kernel(%arg0: i32, %arg1: i32, %arg2: memref<16x128xbf16, #tpu.memory_space<vmem>>, %arg3: memref<128x128xbf16, #tpu.memory_space<vmem>>, %arg4: memref<1x128xf32, #tpu.memory_space<vmem>>, %arg5: memref<128x128xbf16, #tpu.memory_space<vmem>>, %arg6: memref<1x128xf32, #tpu.memory_space<vmem>>, %arg7: memref<128x128xbf16, #tpu.memory_space<vmem>>, %arg8: memref<1x128xf32, #tpu.memory_space<vmem>>, %arg9: memref<16x128xf32, #tpu.memory_space<vmem>>, %arg10: memref<16x128xf32, #tpu.memory_space<vmem>>) attributes {dimension_semantics = [#tpu.dimension_semantics<parallel>, #tpu.dimension_semantics<arbitrary>], iteration_bounds = array<i64: 1, 1>, scalar_prefetch = 0 : i64, scratch_operands = 1 : i64, tpu.core_type = #tpu.core_type<tc>, window_params = [{transform_indices = @transform_0, window_bounds = array<i64: 16, 128>}, {transform_indices = @transform_1, window_bounds = array<i64: 128, 128>}, {transform_indices = @transform_2, window_bounds = array<i64: 1, 128>}, {transform_indices = @transform_3, window_bounds = array<i64: 128, 128>}, {transform_indices = @transform_4, window_bounds = array<i64: 1, 128>}, {transform_indices = @transform_5, window_bounds = array<i64: 128, 128>}, {pipeline_mode = #tpu.pipeline_mode<synchronous>, transform_indices = @transform_6, window_bounds = array<i64: 1, 128>}, {transform_indices = @transform_7, window_bounds = array<i64: 16, 128>}]} {
    %c0_i32 = arith.constant 0 : i32
    %0 = arith.cmpi eq, %arg1, %c0_i32 : i32
    %1 = arith.extui %0 : i1 to i32
    %c0_i32_0 = arith.constant 0 : i32
    %2 = arith.cmpi ne, %1, %c0_i32_0 : i32
    scf.if %2 {
      %c0_21 = arith.constant 0 : index
      %c0_22 = arith.constant 0 : index
      %30 = vector.load %arg8[%c0_21, %c0_22] : memref<1x128xf32, #tpu.memory_space<vmem>>, vector<1x128xf32>
      %31 = vector.shape_cast %30 : vector<1x128xf32> to vector<1x128xf32>
      %32 = vector.broadcast %31 : vector<1x128xf32> to vector<16x128xf32>
      %c0_23 = arith.constant 0 : index
      %c0_24 = arith.constant 0 : index
      %33 = vector.load %arg10[%c0_23, %c0_24] : memref<16x128xf32, #tpu.memory_space<vmem>>, vector<16x128xf32>
      tpu.vector_store %arg10[%c0_23, %c0_24], %32 {strides = array<i32>} : memref<16x128xf32, #tpu.memory_space<vmem>>, vector<16x128xf32>,
    } else {
    }
    %c0 = arith.constant 0 : index
    %c0_1 = arith.constant 0 : index
    %3 = vector.load %arg2[%c0, %c0_1] : memref<16x128xbf16, #tpu.memory_space<vmem>>, vector<16x128xbf16>
    %c0_2 = arith.constant 0 : index
    %c0_3 = arith.constant 0 : index
    %4 = vector.load %arg3[%c0_2, %c0_3] : memref<128x128xbf16, #tpu.memory_space<vmem>>, vector<128x128xbf16>
    %cst = arith.constant dense<0.000000e+00> : vector<16x128xf32>
    %5 = tpu.matmul %3, %4, %cst {dimension_numbers = #tpu.dot_dimension_numbers<[1], [0], [0], [1], [0, 0, 1, 1], [], []>} : vector<16x128xbf16>, vector<128x128xbf16>, vector<16x128xf32> -> vector<16x128xf32>
    %c0_4 = arith.constant 0 : index
    %c0_5 = arith.constant 0 : index
    %6 = vector.load %arg4[%c0_4, %c0_5] : memref<1x128xf32, #tpu.memory_space<vmem>>, vector<1x128xf32>
    %7 = vector.broadcast %6 : vector<1x128xf32> to vector<16x128xf32>
    %8 = arith.addf %5, %7 : vector<16x128xf32>
    %c0_6 = arith.constant 0 : index
    %c0_7 = arith.constant 0 : index
    %9 = vector.load %arg5[%c0_6, %c0_7] : memref<128x128xbf16, #tpu.memory_space<vmem>>, vector<128x128xbf16>
    %cst_8 = arith.constant dense<0.000000e+00> : vector<16x128xf32>
    %10 = tpu.matmul %3, %9, %cst_8 {dimension_numbers = #tpu.dot_dimension_numbers<[1], [0], [0], [1], [0, 0, 1, 1], [], []>} : vector<16x128xbf16>, vector<128x128xbf16>, vector<16x128xf32> -> vector<16x128xf32>
    %c0_9 = arith.constant 0 : index
    %c0_10 = arith.constant 0 : index
    %11 = vector.load %arg6[%c0_9, %c0_10] : memref<1x128xf32, #tpu.memory_space<vmem>>, vector<1x128xf32>
    %12 = vector.broadcast %11 : vector<1x128xf32> to vector<16x128xf32>
    %13 = arith.addf %10, %12 : vector<16x128xf32>
    %14 = arith.negf %13 : vector<16x128xf32>
    %15 = math.exp %14 : vector<16x128xf32>
    %cst_11 = arith.constant 1.000000e+00 : f32
    %16 = vector.broadcast %cst_11 : f32 to vector<16x128xf32>
    %17 = arith.addf %16, %15 : vector<16x128xf32>
    %18 = arith.divf %16, %17 : vector<16x128xf32>
    %19 = arith.mulf %13, %18 : vector<16x128xf32>
    %20 = arith.mulf %8, %19 : vector<16x128xf32>
    %c0_12 = arith.constant 0 : index
    %c0_13 = arith.constant 0 : index
    %21 = vector.load %arg10[%c0_12, %c0_13] : memref<16x128xf32, #tpu.memory_space<vmem>>, vector<16x128xf32>
    %22 = arith.truncf %20 : vector<16x128xf32> to vector<16x128xbf16>
    %c0_14 = arith.constant 0 : index
    %c0_15 = arith.constant 0 : index
    %23 = vector.load %arg7[%c0_14, %c0_15] : memref<128x128xbf16, #tpu.memory_space<vmem>>, vector<128x128xbf16>
    %cst_16 = arith.constant dense<0.000000e+00> : vector<16x128xf32>
    %24 = tpu.matmul %22, %23, %cst_16 {dimension_numbers = #tpu.dot_dimension_numbers<[1], [0], [0], [1], [0, 0, 1, 1], [], []>} : vector<16x128xbf16>, vector<128x128xbf16>, vector<16x128xf32> -> vector<16x128xf32>
    %25 = arith.addf %21, %24 : vector<16x128xf32>
    %c0_17 = arith.constant 0 : index
    %c0_18 = arith.constant 0 : index
    %26 = vector.load %arg10[%c0_17, %c0_18] : memref<16x128xf32, #tpu.memory_space<vmem>>, vector<16x128xf32>
    tpu.vector_store %arg10[%c0_17, %c0_18], %25 {strides = array<i32>} : memref<16x128xf32, #tpu.memory_space<vmem>>, vector<16x128xf32>,
    %c0_i32_19 = arith.constant 0 : i32
    %27 = arith.cmpi eq, %arg1, %c0_i32_19 : i32
    %28 = arith.extui %27 : i1 to i32
    %c0_i32_20 = arith.constant 0 : i32
    %29 = arith.cmpi ne, %28, %c0_i32_20 : i32
    scf.if %29 {
      %c0_21 = arith.constant 0 : index
      %c0_22 = arith.constant 0 : index
      %30 = vector.load %arg10[%c0_21, %c0_22] : memref<16x128xf32, #tpu.memory_space<vmem>>, vector<16x128xf32>
      %c0_23 = arith.constant 0 : index
      %c0_24 = arith.constant 0 : index
      %31 = vector.load %arg9[%c0_23, %c0_24] : memref<16x128xf32, #tpu.memory_space<vmem>>, vector<16x128xf32>
      tpu.vector_store %arg9[%c0_23, %c0_24], %30 {strides = array<i32>} : memref<16x128xf32, #tpu.memory_space<vmem>>, vector<16x128xf32>,
    } else {
    }
    return
  }
  func.func @transform_0(%arg0: i32, %arg1: i32) -> (i32, i32) {
    %c0_i32 = arith.constant 0 : i32
    %c0_i32_0 = arith.constant 0 : i32
    return %arg0, %c0_i32 : i32, i32
  }
  func.func @transform_1(%arg0: i32, %arg1: i32) -> (i32, i32) {
    %c0_i32 = arith.constant 0 : i32
    %c0_i32_0 = arith.constant 0 : i32
    return %c0_i32, %arg1 : i32, i32
  }
  func.func @transform_2(%arg0: i32, %arg1: i32) -> (i32, i32) {
    %c0_i32 = arith.constant 0 : i32
    %c0_i32_0 = arith.constant 0 : i32
    return %c0_i32, %arg1 : i32, i32
  }
  func.func @transform_3(%arg0: i32, %arg1: i32) -> (i32, i32) {
    %c0_i32 = arith.constant 0 : i32
    %c0_i32_0 = arith.constant 0 : i32
    return %c0_i32, %arg1 : i32, i32
  }
  func.func @transform_4(%arg0: i32, %arg1: i32) -> (i32, i32) {
    %c0_i32 = arith.constant 0 : i32
    %c0_i32_0 = arith.constant 0 : i32
    return %c0_i32, %arg1 : i32, i32
  }
  func.func @transform_5(%arg0: i32, %arg1: i32) -> (i32, i32) {
    %c0_i32 = arith.constant 0 : i32
    %c0_i32_0 = arith.constant 0 : i32
    return %arg1, %c0_i32 : i32, i32
  }
  func.func @transform_6(%arg0: i32, %arg1: i32) -> (i32, i32) {
    %c0_i32 = arith.constant 0 : i32
    %c0_i32_0 = arith.constant 0 : i32
    %c0_i32_1 = arith.constant 0 : i32
    return %c0_i32, %c0_i32_0 : i32, i32
  }
  func.func @transform_7(%arg0: i32, %arg1: i32) -> (i32, i32) {
    %c0_i32 = arith.constant 0 : i32
    %c0_i32_0 = arith.constant 0 : i32
    return %arg0, %c0_i32 : i32, i32
  }
}

</mosaic_0001>

<bundles_post_ra>
// kernel: ffn_pallas.1
= control target key start
LH: loop header
LB: loop body
LE: loop exit
PB: predicated region body
PF: predicated region fallthrough
CT: control target
= control target key end

     0   :  { %v563_v0 = vmov 0.0   ;;  %vm564_vm0 = vmmov 0   ;;  %s725_s3 = inlined_call_operand.vmem [shape: bf16[128,128], index: 3, kind: input, shape index: {}]   ;;  %s726_s1 = inlined_call_operand.vmem [shape: bf16[128,128], index: 1, kind: input, shape index: {}]   ;;  %s727_s0 = inlined_call_operand.vmem [shape: bf16[16,128], index: 0, kind: input, shape index: {}]   ;;  %s728_s5 = inlined_call_operand.vmem [shape: bf16[128,128], index: 5, kind: input, shape index: {}]   ;;  %s729_s4 = inlined_call_operand.vmem [shape: f32[1,128], index: 4, kind: input, shape index: {}]   ;;  %s730_s2 = inlined_call_operand.vmem [shape: f32[1,128], index: 2, kind: input, shape index: {}]   ;;  %s731_s6 = inlined_call_operand.vmem [shape: f32[1,128], index: 6, kind: input, shape index: {}]   ;;  %s732_s7 = inlined_call_operand.vmem [shape: f32[16,128], index: 7, kind: output, shape index: {}]  }
   0x1   :  { %488 = vmatprep.subr.bf16.mxu1 %v563_v0  ;;  %v530_v1 = vld [vmem:[%s725_s3] sm:$0xff]   ;;  %468 = vmatprep.subr.bf16.mxu0 %v563_v0  ;;  %v531_v2 = vld [vmem:[%s725_s3 + $0x8] sm:$0xff]   ;;  %v532_v3 = vld [vmem:[%s725_s3 + $0x10] sm:$0xff]  }
   0x2   :  { %504 = vmatprep.mubr.msk.bf16.mxu1 %vm564_vm0, %v563_v0  ;;  %484 = vmatprep.mubr.msk.bf16.mxu0 %vm564_vm0, %v563_v0  ;;  %v537_v4 = vld [vmem:[%s726_s1] sm:$0xff]   ;;  %v539_v5 = vld [vmem:[%s726_s1 + $0x8] sm:$0xff]   ;;  %v533_v6 = vld [vmem:[%s725_s3 + $0x18] sm:$0xff]  }
   0x3   :  { %489 = vmatpush3.bf16.msra.mxu1 %v530_v1  ;;  %469 = vmatpush3.bf16.msra.mxu0 %v537_v4  ;;  %v541_v7 = vld [vmem:[%s726_s1 + $0x10] sm:$0xff]   ;;  %v534_v8 = vld [vmem:[%s725_s3 + $0x20] sm:$0xff]   ;;  %v542_v9 = vld [vmem:[%s726_s1 + $0x18] sm:$0xff]  }
   0x4   :  { %490 = vmatprep.subr.bf16.mxu1 %v563_v0  ;;  %470 = vmatprep.subr.bf16.mxu0 %v563_v0  ;;  %v535_v10 = vld [vmem:[%s725_s3 + $0x28] sm:$0xff]   ;;  %v543_v11 = vld [vmem:[%s726_s1 + $0x20] sm:$0xff]   ;;  %v536_v12 = vld [vmem:[%s725_s3 + $0x30] sm:$0xff]  }
   0x5   :  { %v544_v13 = vld [vmem:[%s726_s1 + $0x28] sm:$0xff]   ;;  %v538_v14 = vld [vmem:[%s725_s3 + $0x38] sm:$0xff]   ;;  %v540_v15 = vld [vmem:[%s727_s0] sm:$0xff]  }
   0x6   :  { %v545_v16 = vld [vmem:[%s726_s1 + $0x30] sm:$0xff]   ;;  %v546_v17 = vld [vmem:[%s726_s1 + $0x38] sm:$0xff]   ;;  %v547_v18 = vld [vmem:[%s728_s5] sm:$0xff]  }
   0x7   :  { %491 = vmatpush3.bf16.msra.mxu1 %v531_v2  ;;  %471 = vmatpush3.bf16.msra.mxu0 %v539_v5  ;;  %v548_v19 = vld [vmem:[%s728_s5 + $0x8] sm:$0xff]   ;;  %v549_v20 = vld [vmem:[%s728_s5 + $0x10] sm:$0xff]   ;;  %v550_v21 = vld [vmem:[%s728_s5 + $0x18] sm:$0xff]  }
   0x8   :  { %492 = vmatprep.subr.bf16.mxu1 %v563_v0  ;;  %472 = vmatprep.subr.bf16.mxu0 %v563_v0  ;;  %v551_v22 = vld [vmem:[%s728_s5 + $0x20] sm:$0xff]   ;;  %v552_v23 = vld [vmem:[%s728_s5 + $0x28] sm:$0xff]   ;;  %v553_v24 = vld [vmem:[%s728_s5 + $0x30] sm:$0xff]  }
   0x9   :  { %v554_v25 = vld [vmem:[%s728_s5 + $0x38] sm:$0xff]   ;;  %v422_v26 = vld [vmem:[%s729_s4] ss:$0 sm:$0xff] }
   0xa   :  { %v412_v43 = vld [vmem:[%s730_s2] ss:$0 sm:$0xff] }
   0xb   :  { %493 = vmatpush3.bf16.msra.mxu1 %v532_v3  ;;  %473 = vmatpush3.bf16.msra.mxu0 %v541_v7  ;;  %v411_v53 = vld [vmem:[%s731_s6] ss:$0 sm:$0xff] }
   0xc   :  { %494 = vmatprep.subr.bf16.mxu1 %v563_v0  ;;  %474 = vmatprep.subr.bf16.mxu0 %v563_v0 }
   0xf   :  { %495 = vmatpush3.bf16.msra.mxu1 %v533_v6  ;;  %475 = vmatpush3.bf16.msra.mxu0 %v542_v9 }
  0x10   :  { %496 = vmatprep.subr.bf16.mxu1 %v563_v0  ;;  %476 = vmatprep.subr.bf16.mxu0 %v563_v0 }
  0x13   :  { %497 = vmatpush3.bf16.msra.mxu1 %v534_v8  ;;  %477 = vmatpush3.bf16.msra.mxu0 %v543_v11 }
  0x14   :  { %498 = vmatprep.subr.bf16.mxu1 %v563_v0  ;;  %478 = vmatprep.subr.bf16.mxu0 %v563_v0 }
  0x17   :  { %499 = vmatpush3.bf16.msra.mxu1 %v535_v10  ;;  %479 = vmatpush3.bf16.msra.mxu0 %v544_v13 }
  0x18   :  { %500 = vmatprep.subr.bf16.mxu1 %v563_v0  ;;  %480 = vmatprep.subr.bf16.mxu0 %v563_v0 }
  0x1b   :  { %501 = vmatpush3.bf16.msra.mxu1 %v536_v12  ;;  %481 = vmatpush3.bf16.msra.mxu0 %v545_v16 }
  0x1c   :  { %502 = vmatprep.subr.bf16.mxu1 %v563_v0  ;;  %482 = vmatprep.subr.bf16.mxu0 %v563_v0 }
  0x1f   :  { %503 = vmatpush3.bf16.msra.mxu1 %v538_v14  ;;  %483 = vmatpush3.bf16.msra.mxu0 %v546_v17 }
  0x20   :  { %508 = vmatprep.subr.bf16.mxu0 %v563_v0 }
  0x22   :  { %505 = vmatmul.mubr.bf16.vlgmr.msra.gmra.mrb[0].mxu1 %v540_v15  ;;  %485 = vmatmul.mubr.bf16.vlgmr.msra.gmra.mrb[0].mxu0 %v540_v15 }
  0x23   :  { %524 = vmatprep.mubr.msk.bf16.mxu0 %vm564_vm0, %v563_v0  ;;  %509 = vmatpush3.bf16.msra.mxu0 %v547_v18 }
  0x24   :  { %510 = vmatprep.subr.bf16.mxu0 %v563_v0 }
  0x27   :  { %511 = vmatpush3.bf16.msra.mxu0 %v548_v19 }
  0x28   :  { %512 = vmatprep.subr.bf16.mxu0 %v563_v0 }
  0x2b   :  { %513 = vmatpush3.bf16.msra.mxu0 %v549_v20 }
  0x2c   :  { %514 = vmatprep.subr.bf16.mxu0 %v563_v0 }
  0x2f   :  { %515 = vmatpush3.bf16.msra.mxu0 %v550_v21 }
  0x30   :  { %516 = vmatprep.subr.bf16.mxu0 %v563_v0 }
  0x33   :  { %517 = vmatpush3.bf16.msra.mxu0 %v551_v22 }
  0x34   :  { %518 = vmatprep.subr.bf16.mxu0 %v563_v0 }
  0x37   :  { %519 = vmatpush3.bf16.msra.mxu0 %v552_v23 }
  0x38   :  { %520 = vmatprep.subr.bf16.mxu0 %v563_v0 }
  0x3b   :  { %521 = vmatpush3.bf16.msra.mxu0 %v553_v24 }
  0x3c   :  { %522 = vmatprep.subr.bf16.mxu0 %v563_v0 }
  0x3f   :  { %523 = vmatpush3.bf16.msra.mxu0 %v554_v25 }
  0xf5   :  { %v265_v27 = vpop.f32.mrb[0].mxu1  ;;  %v153_v35 = vpop.f32.mrb[0].mxu0 }
  0xf6   :  { %v266_v28 = vadd.f32 %v422_v26, %v265_v27  ;;  %v506_v29 = vpop.f32.mrb[1].mxu1  ;;  %v486_v36 = vpop.f32.mrb[1].mxu0  ;;  %v154_v44 = vadd.f32 %v412_v43, %v153_v35 }
  0xf7   :  { %v268_v30 = vpop.f32.mrb[2].mxu1  ;;  %v156_v37 = vpop.f32.mrb[2].mxu0 }
  0xf8   :  { %v431_v31 = vmul.f32 -1.442695, %v266_v28  ;;  %v269_v32 = vadd.f32 %v422_v26, %v268_v30  ;;  %v507_v33 = vpop.f32.mrb[3].mxu1  ;;  %v487_v38 = vpop.f32.mrb[3].mxu0  ;;  %v157_v50 = vadd.f32 %v412_v43, %v156_v37 }
  0xfa   :  { %555 = vpow2.f32 %v431_v31  ;;  %v432_v34 = vmul.f32 -1.442695, %v269_v32 }
  0xfc   :  { %557 = vpow2.f32 %v432_v34 }
 0x104   :  { %v556_v39 = vpop.eup %555 }
 0x105   :  { %v278_v40 = vadd.f32 1.0, %v556_v39 }
 0x106   :  { %v558_v41 = vpop.eup %557 }
 0x107   :  { %559 = vrcp.f32 %v278_v40  ;;  %v279_v42 = vadd.f32 1.0, %v558_v41 }
 0x109   :  { %561 = vrcp.f32 %v279_v42 }
 0x111   :  { %v560_v45 = vpop.eup %559 }
 0x112   :  { %v284_v46 = vmul.f32 %v560_v45, %v266_v28 }
 0x113   :  { %v562_v47 = vpop.eup %561 }
 0x114   :  { %v285_v48 = vmul.f32 %v562_v47, %v269_v32  ;;  %v286_v49 = vmul.f32 %v284_v46, %v154_v44 }
 0x116   :  { %v287_v51 = vmul.f32 %v285_v48, %v157_v50 }
 0x118   :  { %v290_v52 = vpack.c.bf16 %v287_v51, %v286_v49 }
 0x11a   :  { %525 = vmatmul.mubr.bf16.vlgmr.msra.gmra.mrb[4].mxu0 %v290_v52 }
 0x1ed   :  { %v389_v54 = vpop.f32.mrb[4].mxu0 }
 0x1ee   :  { %v396_v55 = vadd.f32 %v411_v53, %v389_v54  ;;  %v526_v56 = vpop.f32.mrb[5].mxu0 }
 0x1ef   :  { %v392_v57 = vpop.f32.mrb[6].mxu0 }
 0x1f0   :  { %405 = vst [vmem:[%s732_s7] sm:$0xff] %v396_v55  ;;  %v397_v58 = vadd.f32 %v411_v53, %v392_v57  ;;  %v527_v59 = vpop.f32.mrb[7].mxu0 }
 0x1f2   :  { %406 = vst [vmem:[%s732_s7 + $0x8] sm:$0xff] %v397_v58 }

</bundles_post_ra>
